<compile_context>
chip_gen: v7x
topology: tpu7x:2x2x1
jax: 0.10.0
libtpu: 0.0.40
codegen_flags: <defaults>
</compile_context>

<pallas_src>
import functools

import numpy as np
import jax
import jax.numpy as jnp
from jax import lax
from jax.experimental import pallas as pl
from jax.experimental.pallas import tpu as pltpu


# ----------------------------------------------------------------------------
# Stage 1: cosine weighting + Ram-Lak filtering (batched Toeplitz matmul)
# ----------------------------------------------------------------------------
def _filter_kernel(x_ref, cosw_ref, filt_ref, o_ref):
    x = x_ref[...]                                    # (P, nh, nw) f32
    pw = x * cosw_ref[...][None, :, :]                # FDK cosine weighting
    p, nh, nw = pw.shape
    pf = jnp.dot(pw.reshape(p * nh, nw).astype(jnp.bfloat16),
                 filt_ref[...],                       # bf16 Toeplitz ramp
                 preferred_element_type=jnp.float32)  # MXU, f32 accumulate
    o_ref[...] = pf.reshape(p, nh, nw).astype(jnp.bfloat16)


# ----------------------------------------------------------------------------
# Stage 2: voxel-tiled cone-beam backprojection with in-kernel geometry
# ----------------------------------------------------------------------------
def _bp_kernel(trig_ref, pf_ref, xyz_ref, out_ref, iota2_ref, iota1_ref, *,
               dso, ku, kv, cu, cv, wscale, rows_on_mxu):
    a = pl.program_id(1)

    @pl.when(a == 0)
    def _():
        out_ref[...] = jnp.zeros_like(out_ref)
        # Hoisted detector-index iotas: built once per voxel tile, reused for
        # every angle (removes per-step iota + int->float casts from the VALU).
        d2, nt2 = iota2_ref.shape
        d1, nt1 = iota1_ref.shape
        iota2_ref[...] = lax.broadcasted_iota(
            jnp.int32, (d2, nt2), 0).astype(jnp.float32)
        iota1_ref[...] = lax.broadcasted_iota(
            jnp.int32, (d1, nt1), 0).astype(jnp.float32)

    cb = trig_ref[0, a]                               # cos(beta), SMEM scalar
    sb = trig_ref[1, a]                               # sin(beta), SMEM scalar

    xyz = xyz_ref[...]                                # (3, NT) resident coords
    xv = xyz[0:1, :]
    yv = xyz[1:2, :]
    zv = xyz[2:3, :]
    nt = xyz.shape[-1]

    b, d1, d2 = pf_ref.shape

    # ---- per-voxel detector coordinates + FDK distance weight -------------
    t = xv * cb + yv * sb
    s = -xv * sb + yv * cb
    denom = dso - t
    safe = jnp.maximum(denom, 1e-3)
    inv0 = pl.reciprocal(safe, approx=True)           # EUP seed
    inv = inv0 * (2.0 - safe * inv0)                  # Newton step -> ~exact
    iu = ku * (s * inv) + cu                          # fractional det column
    iv = kv * (zv * inv) + cv                         # fractional det row
    wgt = jnp.where(denom > 1e-3, wscale * (inv * inv), 0.0)  # (1, NT)

    # ---- bilinear "hat" weights (iota hoisted; sub/abs/max only) ------------
    idx2 = iv if rows_on_mxu else iu                  # coord along MXU axis
    idx1 = iu if rows_on_mxu else iv                  # coord along VPU axis
    hat2 = jnp.maximum(1.0 - jnp.abs(iota2_ref[...] - idx2), 0.0)   # (d2, NT)
    hat1 = jnp.maximum(1.0 - jnp.abs(iota1_ref[...] - idx1), 0.0)   # (d1, NT)

    # ---- batch-stacked sampling matmul (bf16 operands, f32 accumulate) -----
    pf = pf_ref[...]                                  # (B, d1, d2) bf16
    tmp = jnp.dot(pf.reshape(b * d1, d2),
                  hat2.astype(jnp.bfloat16),
                  preferred_element_type=jnp.float32) # (B*d1, NT)
    tmp = tmp.reshape(b, d1, nt)

    sample = jnp.sum(tmp * hat1[None, :, :], axis=1)  # (B, NT), VPU reduce
    out_ref[...] += wgt * sample


# ----------------------------------------------------------------------------
# Deterministic geometry glue (numpy, computed once)
# ----------------------------------------------------------------------------
def _build_geometry(param):
    nz, nx, ny = param['nz'], param['nx'], param['ny']
    nh, nw, nproj = param['nh'], param['nw'], param['nProj']
    sz, sx, sy = param['sz'], param['sx'], param['sy']
    sh, sw = param['sh'], param['sw']
    dso, dde = param['dso'], param['dde']
    L = dso + dde

    def centers(extent, n):
        d = extent / n
        return -extent / 2.0 + (np.arange(n) + 0.5) * d

    zc, xc, yc = centers(sz, nz), centers(sx, nx), centers(sy, ny)
    Z, X, Y = np.meshgrid(zc, xc, yc, indexing='ij')          # (nz, nx, ny)
    xyz = np.stack([X.reshape(-1), Y.reshape(-1), Z.reshape(-1)], axis=0)

    ang_range = param['end_angle'] - param['start_angle']
    dbeta = ang_range / nproj
    betas = param['start_angle'] + (np.arange(nproj) + 0.5) * dbeta
    trig = np.stack([np.cos(betas), np.sin(betas)], axis=0)   # (2, nProj)

    du, dv = sw / nw, sh / nh

    # FDK cosine weights on the detector (scaled to virtual detector at origin)
    uc = centers(sw, nw) * dso / L
    vc = centers(sh, nh) * dso / L
    cosw = dso / np.sqrt(dso ** 2 + uc[None, :] ** 2 + vc[:, None] ** 2)

    # Ram-Lak ramp filter, spatial-domain kernel -> Toeplitz conv matrix.
    du_v = du * dso / L
    n = np.arange(-(nw - 1), nw)
    h = np.zeros(n.shape, dtype=np.float64)
    h[n == 0] = 1.0 / (4.0 * du_v ** 2)
    odd = (n % 2) != 0
    h[odd] = -1.0 / (np.pi ** 2 * (n[odd].astype(np.float64) ** 2) * du_v ** 2)
    idx = np.arange(nw)
    filt = h[idx[None, :] - idx[:, None] + (nw - 1)] * du_v   # (nw, nw)

    # Full-scan FDK carries the canonical 1/2 factor (short-scan Parker
    # weighting not implemented -> TODO at top of file).
    scan_factor = 0.5 if ang_range >= 2.0 * np.pi - 1e-6 else 1.0

    consts = dict(
        dso=float(dso),
        ku=float(L / du),
        kv=float(L / dv),
        cu=float(0.5 * sw / du - 0.5),
        cv=float(0.5 * sh / dv - 0.5),
        wscale=float(dso * dso * dbeta * scan_factor),
    )
    return (np.asarray(cosw, np.float32), np.asarray(filt, np.float32),
            np.asarray(xyz, np.float32), np.asarray(trig, np.float32), consts)


def _round_up(n, m):
    return ((n + m - 1) // m) * m


def _device_tuning():
    """Per-generation (n_tile_cap, vmem_limit_bytes)."""
    try:
        kind = jax.devices()[0].device_kind.lower()
    except Exception:
        kind = ""
    if "v7" in kind:
        return 2048, 48 * 1024 * 1024      # 64 MiB VMEM/core: keep headroom
    if "v6" in kind or "v5" in kind:
        return 4096, 64 * 1024 * 1024      # 128 MiB physical VMEM
    return 2048, 32 * 1024 * 1024          # conservative fallback


# ----------------------------------------------------------------------------
# Wrapper
# ----------------------------------------------------------------------------
def fbp_conebeam(x, param, *, n_tile_cap=None, vmem_limit=None):
    cosw, filt, xyz, trig, c = _build_geometry(param)
    B, nproj, nh, nw = x.shape
    nz, nx, ny = param['nz'], param['nx'], param['ny']
    N = nz * nx * ny

    tuned_nt, tuned_vmem = _device_tuning()
    if n_tile_cap is None:
        n_tile_cap = tuned_nt
    if vmem_limit is None:
        vmem_limit = tuned_vmem

    # Pad detector rows to a multiple of 8 so the (B*nh, nw) dim-merge reshapes
    # in both kernels are layout-free.  Padded rows are zero -> contribute 0.
    nh_p = _round_up(nh, 8)
    if nh_p != nh:
        x = jnp.pad(x, ((0, 0), (0, 0), (0, nh_p - nh), (0, 0)))
        cosw = np.pad(cosw, ((0, nh_p - nh), (0, 0)))

    # ---- Stage 1: filter all projections with one tiled matmul ------------
    BP = B * nproj
    p_tile = max(1, min(BP, 4096 // max(nh_p, 1)))    # ~4K stacked MXU rows
    BP_pad = _round_up(BP, p_tile)                    # pad instead of divisor search
    x_flat = x.reshape(BP, nh_p, nw)
    if BP_pad != BP:
        x_flat = jnp.pad(x_flat, ((0, BP_pad - BP), (0, 0), (0, 0)))

    pf_flat = pl.pallas_call(
        _filter_kernel,
        out_shape=jax.ShapeDtypeStruct((BP_pad, nh_p, nw), jnp.bfloat16),
        grid=(BP_pad // p_tile,),
        in_specs=[
            pl.BlockSpec((p_tile, nh_p, nw), lambda i: (i, 0, 0)),  # sinogram
            pl.BlockSpec((nh_p, nw), lambda i: (0, 0)),             # cos weights
            pl.BlockSpec((nw, nw), lambda i: (0, 0)),               # Ram-Lak
        ],
        out_specs=pl.BlockSpec((p_tile, nh_p, nw), lambda i: (i, 0, 0)),
        compiler_params=pltpu.CompilerParams(
            dimension_semantics=("parallel",),
            vmem_limit_bytes=vmem_limit),
    )(x_flat, jnp.asarray(cosw), jnp.asarray(filt, dtype=jnp.bfloat16))
    pf = pf_flat[:BP].reshape(B, nproj, nh_p, nw)     # bf16 in HBM

    # Put the LARGER detector axis on the MXU contraction (smaller on the VPU
    # multiply-reduce); one-time HBM transpose if the detector is tall.
    rows_on_mxu = nh_p > nw
    if rows_on_mxu:
        pf = jnp.swapaxes(pf, 2, 3)                   # (B, nproj, nw, nh_p)
        d1, d2 = nw, nh_p
    else:
        d1, d2 = nh_p, nw

    # ---- Stage 2: voxel-tiled backprojection -------------------------------
    n_tile = min(n_tile_cap, _round_up(N, 128))       # lane-aligned voxel tile
    n_pad = _round_up(N, n_tile)
    xyz_pad = np.zeros((3, n_pad), np.float32)        # pad voxels sit at origin
    xyz_pad[:, :N] = xyz
    num_tiles = n_pad // n_tile

    kernel = functools.partial(_bp_kernel, rows_on_mxu=rows_on_mxu, **c)
    cost = pl.CostEstimate(
        flops=int(2 * B * d1 * d2 * n_pad * nproj          # sampling matmul
                  + 2 * B * d1 * n_pad * nproj             # VPU reduce
                  + 8 * (d1 + d2) * n_pad * nproj),        # hat build
        transcendentals=int(n_pad * nproj),
        bytes_accessed=int((B * d1 * d2 * 2) * num_tiles * nproj   # bf16 pf
                           + 3 * n_pad * 4 * nproj
                           + 2 * B * n_pad * 4))

    vol = pl.pallas_call(
        kernel,
        out_shape=jax.ShapeDtypeStruct((B, n_pad), jnp.float32),
        grid_spec=pltpu.PrefetchScalarGridSpec(
            num_scalar_prefetch=1,                    # cos/sin table in SMEM
            grid=(num_tiles, nproj),                  # angle innermost -> acc
            in_specs=[
                # filtered sinogram: whole batch, one angle (angle dim squeezed)
                pl.BlockSpec((B, None, d1, d2), lambda t, a, _: (0, a, 0, 0)),
                # per-voxel coordinates for this voxel tile
                pl.BlockSpec((3, n_tile), lambda t, a, _: (0, t)),
            ],
            out_specs=pl.BlockSpec((B, n_tile), lambda t, a, _: (0, t)),
            scratch_shapes=[
                pltpu.VMEM((d2, n_tile), jnp.float32),   # hoisted iota (MXU ax)
                pltpu.VMEM((d1, n_tile), jnp.float32),   # hoisted iota (VPU ax)
            ],
        ),
        compiler_params=pltpu.CompilerParams(
            dimension_semantics=("parallel", "arbitrary"),
            vmem_limit_bytes=vmem_limit),
        cost_estimate=cost,
    )(jnp.asarray(trig), pf, jnp.asarray(xyz_pad))

    return vol[:, :N].reshape(B, nz, nx, ny)


if __name__ == "__main__":
    param = dict(
        nx=8, ny=8, nz=8,
        sx=2.0, sy=2.0, sz=2.0,
        nh=16, nw=16,
        sh=8.0, sw=8.0,
        nProj=8,
        start_angle=0.0, end_angle=2.0 * np.pi,
        dso=4.0, dde=4.0,
    )
    B = 2
    key = jax.random.PRNGKey(0)
    x = jax.random.normal(
        key, (B, param['nProj'], param['nh'], param['nw']), dtype=jnp.float32)

    vol = fbp_conebeam(x, param)
    vol = jax.block_until_ready(vol)

    assert vol.shape == (B, param['nz'], param['nx'], param['ny'])
    assert vol.dtype == jnp.float32
    assert bool(jnp.all(jnp.isfinite(vol)))
    print("KERNEL_OK")
</pallas_src>

<mosaic_0001>
module attributes {stable_mosaic.version = 11 : i64} {
  func.func @_filter_kernel(%arg0: i32, %arg1: memref<16x16x16xf32, #tpu.memory_space<vmem>>, %arg2: memref<16x16xf32, #tpu.memory_space<vmem>>, %arg3: memref<16x16xbf16, #tpu.memory_space<vmem>>, %arg4: memref<16x16x16xbf16, #tpu.memory_space<vmem>>) attributes {dimension_semantics = [#tpu.dimension_semantics<parallel>], iteration_bounds = array<i64: 1>, scalar_prefetch = 0 : i64, scratch_operands = 0 : i64, tpu.core_type = #tpu.core_type<tc>, window_params = [{transform_indices = @transform_0, window_bounds = array<i64: 16, 16, 16>}, {pipeline_mode = #tpu.pipeline_mode<synchronous>, transform_indices = @transform_1, window_bounds = array<i64: 16, 16>}, {pipeline_mode = #tpu.pipeline_mode<synchronous>, transform_indices = @transform_2, window_bounds = array<i64: 16, 16>}, {transform_indices = @transform_3, window_bounds = array<i64: 16, 16, 16>}]} {
    %c0 = arith.constant 0 : index
    %c0_0 = arith.constant 0 : index
    %c0_1 = arith.constant 0 : index
    %0 = vector.load %arg1[%c0, %c0_0, %c0_1] : memref<16x16x16xf32, #tpu.memory_space<vmem>>, vector<16x16x16xf32>
    %c0_2 = arith.constant 0 : index
    %c0_3 = arith.constant 0 : index
    %1 = vector.load %arg2[%c0_2, %c0_3] : memref<16x16xf32, #tpu.memory_space<vmem>>, vector<16x16xf32>
    %2 = vector.shape_cast %1 : vector<16x16xf32> to vector<1x16x16xf32>
    %3 = vector.broadcast %2 : vector<1x16x16xf32> to vector<16x16x16xf32>
    %4 = arith.mulf %0, %3 : vector<16x16x16xf32>
    %5 = vector.shape_cast %4 : vector<16x16x16xf32> to vector<256x16xf32>
    %6 = arith.truncf %5 : vector<256x16xf32> to vector<256x16xbf16>
    %c0_4 = arith.constant 0 : index
    %c0_5 = arith.constant 0 : index
    %7 = vector.load %arg3[%c0_4, %c0_5] : memref<16x16xbf16, #tpu.memory_space<vmem>>, vector<16x16xbf16>
    %cst = arith.constant dense<0.000000e+00> : vector<256x16xf32>
    %8 = tpu.matmul %6, %7, %cst {dimension_numbers = #tpu.dot_dimension_numbers<[1], [0], [0], [1], [0, 0, 1, 1], [], []>} : vector<256x16xbf16>, vector<16x16xbf16>, vector<256x16xf32> -> vector<256x16xf32>
    %9 = vector.shape_cast %8 : vector<256x16xf32> to vector<16x16x16xf32>
    %10 = arith.truncf %9 : vector<16x16x16xf32> to vector<16x16x16xbf16>
    %c0_6 = arith.constant 0 : index
    %c0_7 = arith.constant 0 : index
    %c0_8 = arith.constant 0 : index
    %11 = vector.load %arg4[%c0_6, %c0_7, %c0_8] : memref<16x16x16xbf16, #tpu.memory_space<vmem>>, vector<16x16x16xbf16>
    tpu.vector_store %arg4[%c0_6, %c0_7, %c0_8], %10 {strides = array<i32>} : memref<16x16x16xbf16, #tpu.memory_space<vmem>>, vector<16x16x16xbf16>,
    return
  }
  func.func @transform_0(%arg0: i32) -> (i32, i32, i32) {
    %c0_i32 = arith.constant 0 : i32
    %c0_i32_0 = arith.constant 0 : i32
    %c0_i32_1 = arith.constant 0 : i32
    return %arg0, %c0_i32, %c0_i32_0 : i32, i32, i32
  }
  func.func @transform_1(%arg0: i32) -> (i32, i32) {
    %c0_i32 = arith.constant 0 : i32
    %c0_i32_0 = arith.constant 0 : i32
    %c0_i32_1 = arith.constant 0 : i32
    return %c0_i32, %c0_i32_0 : i32, i32
  }
  func.func @transform_2(%arg0: i32) -> (i32, i32) {
    %c0_i32 = arith.constant 0 : i32
    %c0_i32_0 = arith.constant 0 : i32
    %c0_i32_1 = arith.constant 0 : i32
    return %c0_i32, %c0_i32_0 : i32, i32
  }
  func.func @transform_3(%arg0: i32) -> (i32, i32, i32) {
    %c0_i32 = arith.constant 0 : i32
    %c0_i32_0 = arith.constant 0 : i32
    %c0_i32_1 = arith.constant 0 : i32
    return %arg0, %c0_i32, %c0_i32_0 : i32, i32, i32
  }
}

</mosaic_0001>

<bundles_post_ra>
// kernel: tpu_custom_call.1
= control target key start
LH: loop header
LB: loop body
LE: loop exit
PB: predicated region body
PF: predicated region fallthrough
CT: control target
= control target key end

     0   :  { %8 = vsyncpa [#allocation3], 0  ;;  %s946_s0 = inlined_call_operand.hbm [shape: f32[16,16,16], index: 0, kind: input, shape index: {}]   ;;  %s947_s1 = inlined_call_operand.hbm [shape: f32[16,16], index: 1, kind: input, shape index: {}]   ;;  %s948_s2 = inlined_call_operand.hbm [shape: bf16[16,16], index: 2, kind: input, shape index: {}]   ;;  %s949_s3 = inlined_call_operand.hbm [shape: bf16[16,16,16], index: 3, kind: output, shape index: {}]  }
   0x1   :  { %9 = vsyncpa [#allocation6], 0 }
   0x2   :  { %10 = vsyncpa [#allocation4], 0  ;;  %s773_s12 = smov [#allocation5]   ;;  %s774_s14 = smov [#allocation2]  }
   0x3   :  { %s28_s13 = sshll.u32 %s773_s12, 4  ;;  %s16_s15 = sshll.u32 %s774_s14, 4  ;;  %s29_s13 = int_to_ptr.vmem [resolvable:$true] %s28_s13  ;;  %s801_s15 = int_to_ptr.vmem [resolvable:$true] %s16_s15 }
   0x4   :  { %s679_s18 = scalar_lea.hbm %s947_s1, 256 }
   0x5   :  { %p680_p0 = scmp.ne.s32.totalorder %s947_s1, %s679_s18  ;;  %p683_p1 = scmp.lt.u32.totalorder %s679_s18, %s947_s1 }
   0x7   :  { %p685_p2 = pnand %p683_p1, %p680_p0 }
   0x9   :  { %688 = shalt.err (!%p685_p2)
}
   0xa   :  { %s689_s23 = scalar_lea.vmem %s29_s13, 256  ;;  %p694_p4 = scmp.lt.s32.totalorder %s29_s13, %s29_s13 }
   0xb   :  { %p690_p3 = scmp.ne.s32.totalorder %s29_s13, %s689_s23  ;;  %p695_p5 = scmp.lt.s32.totalorder %s689_s23, %s689_s23 }
   0xd   :  { %p696_p6 = por %p695_p5, %p694_p4 }
   0xf   :  { %p697_p7 = pnand %p696_p6, %p690_p3 }
  0x11   :  { %700 = shalt.err (!%p697_p7)
}
  0x12   :  { %s775_s24 = smov 128   ;;  %s776_s25 = smov 8  }
  0x13   :  { %34 = dma.hbm_to_vmem [thread:$0]  %s947_s1, 256, %s29_s13, [#allocation6], %s775_s24, %s775_s24, %s776_s25  }
  0x14   :  { %s701_s30 = scalar_lea.hbm %s946_s0, 4096 }
  0x15   :  { %p702_p8 = scmp.ne.s32.totalorder %s946_s0, %s701_s30  ;;  %p705_p9 = scmp.lt.u32.totalorder %s701_s30, %s946_s0 }
  0x17   :  { %p707_p10 = pnand %p705_p9, %p702_p8 }
  0x19   :  { %710 = shalt.err (!%p707_p10)
}
  0x1a   :  { %s711_s8 = scalar_lea.vmem %s801_s15, 4096  ;;  %p716_p12 = scmp.lt.s32.totalorder %s801_s15, %s801_s15 }
  0x1b   :  { %p712_p11 = scmp.ne.s32.totalorder %s801_s15, %s711_s8  ;;  %p717_p13 = scmp.lt.s32.totalorder %s711_s8, %s711_s8 }
  0x1d   :  { %p718_p0 = por %p717_p13, %p716_p12 }
  0x1f   :  { %p719_p1 = pnand %p718_p0, %p712_p11 }
  0x21   :  { %722 = shalt.err (!%p719_p1)
}
  0x22   :  { %22 = dma.hbm_to_vmem [thread:$0]  %s946_s0, 4096, %s801_s15, [#allocation3], %s775_s24, %s775_s24, %s776_s25  }
  0x23   :  { %s777_s10 = smov [#allocation7]   ;;  %s723_s14 = scalar_lea.hbm %s948_s2, 128 }
  0x24   :  { %s40_s11 = sshll.u32 %s777_s10, 4  ;;  %p724_p2 = scmp.ne.s32.totalorder %s948_s2, %s723_s14  ;;  %s41_s11 = int_to_ptr.vmem [resolvable:$true] %s40_s11 }
  0x25   :  { %p727_p3 = scmp.lt.u32.totalorder %s723_s14, %s948_s2 }
  0x27   :  { %p729_p4 = pnand %p727_p3, %p724_p2 }
  0x29   :  { %732 = shalt.err (!%p729_p4)
}
  0x2a   :  { %s733_s20 = scalar_lea.vmem %s41_s11, 128  ;;  %p738_p6 = scmp.lt.s32.totalorder %s41_s11, %s41_s11 }
  0x2b   :  { %p734_p5 = scmp.ne.s32.totalorder %s41_s11, %s733_s20  ;;  %p739_p7 = scmp.lt.s32.totalorder %s733_s20, %s733_s20 }
  0x2d   :  { %p740_p8 = por %p739_p7, %p738_p6 }
  0x2f   :  { %p741_p9 = pnand %p740_p8, %p734_p5 }
  0x31   :  { %744 = shalt.err (!%p741_p9)
}
  0x32   :  { %s778_s0 = smov 64   ;;  %s779_s15 = smov 4  }
  0x33   :  { %46 = dma.hbm_to_vmem [thread:$0]  %s948_s2, 128, %s41_s11, [#allocation6], %s778_s0, %s778_s0, %s779_s15  }
  0x34   :  { %767 = dma.done.wait [#allocation3], 4096  }
  0x35   :  { %768 = vsyncadd [#allocation3], 4294963200 }
  0x36   :  { %769 = dma.done.wait [#allocation6], 384  }
  0x37   :  { %770 = vsyncadd [#allocation6], 4294966912  ;;  %v678_v0 = vld [vmem:[#allocation7] sm:$0xff]   ;;  %v57_v1 = vld [vmem:[#allocation2] sm:$0xff]  ;;  %vm147_vm0 = vcmask 130048   ;;  %vm485_vm1 = vcmask 125952  }
  0x38   :  { %v58_v2 = vld [vmem:[#allocation2 + $0x8] sm:$0xff]  ;;  %v847_v3 = vld [vmem:[#allocation5] sm:$0xff]  ;;  %634 = vmatprep.subr.bf16.mxu0 %v678_v0  ;;  %668 = vmatprep.subr.bf16.mxu1 %v678_v0  ;;  %v59_v11 = vld [vmem:[#allocation2 + $0x10] sm:$0xff]  ;;  %s780_s2 = smov [#allocation8]  }
  0x39   :  { %v849_v4 = vld [vmem:[#allocation5 + $0x8] sm:$0xff]  ;;  %v91_v5 = vmul.f32 %v847_v3, %v57_v1  ;;  %v73_v6 = vld [vmem:[#allocation2 + $0x80] sm:$0xff]  ;;  %635 = vmatpush3.bf16.msra.mxu0 %v678_v0  ;;  %669 = vmatpush3.bf16.msra.mxu1 %v678_v0  ;;  %v60_v12 = vld [vmem:[#allocation2 + $0x18] sm:$0xff]  ;;  %v93_v14 = vmul.f32 %v847_v3, %v59_v11  ;;  %s523_s23 = sshll.u32 %s780_s2, 4  ;;  %s524_s23 = int_to_ptr.vmem [resolvable:$true] %s523_s23 }
  0x3a   :  { %v74_v7 = vld [vmem:[#allocation2 + $0x88] sm:$0xff]  ;;  %v92_v8 = vmul.f32 %v849_v4, %v58_v2  ;;  %v107_v9 = vmul.f32 %v847_v3, %v73_v6  ;;  %v75_v13 = vld [vmem:[#allocation2 + $0x90] sm:$0xff]  ;;  %v94_v15 = vmul.f32 %v849_v4, %v60_v12  ;;  %v76_v16 = vld [vmem:[#allocation2 + $0x98] sm:$0xff]  ;;  %s745_s24 = scalar_lea.vmem %s524_s23, 2048  ;;  %p750_p11 = scmp.lt.s32.totalorder %s524_s23, %s524_s23 }
  0x3b   :  { %v108_v10 = vmul.f32 %v849_v4, %v74_v7  ;;  %v109_v17 = vmul.f32 %v847_v3, %v75_v13  ;;  %v61_v18 = vld [vmem:[#allocation2 + $0x20] sm:$0xff]  ;;  %v62_v19 = vld [vmem:[#allocation2 + $0x28] sm:$0xff]  ;;  %v110_v22 = vmul.f32 %v849_v4, %v76_v16  ;;  %v63_v26 = vld [vmem:[#allocation2 + $0x30] sm:$0xff]  ;;  %p746_p10 = scmp.ne.s32.totalorder %s524_s23, %s745_s24  ;;  %p751_p12 = scmp.lt.s32.totalorder %s745_s24, %s745_s24 }
  0x3c   :  { %v123_v20 = vpack.c.bf16 %v92_v8, %v91_v5  ;;  %v95_v23 = vmul.f32 %v847_v3, %v61_v18  ;;  %v77_v24 = vld [vmem:[#allocation2 + $0xa0] sm:$0xff]  ;;  %v78_v25 = vld [vmem:[#allocation2 + $0xa8] sm:$0xff]  ;;  %v124_v27 = vpack.c.bf16 %v94_v15, %v93_v14  ;;  %v96_v28 = vmul.f32 %v849_v4, %v62_v19  ;;  %v64_v31 = vld [vmem:[#allocation2 + $0x38] sm:$0xff] }
  0x3d   :  { %v131_v21 = vpack.c.bf16 %v108_v10, %v107_v9  ;;  %v111_v29 = vmul.f32 %v847_v3, %v77_v24  ;;  %v112_v30 = vmul.f32 %v849_v4, %v78_v25  ;;  %v79_v32 = vld [vmem:[#allocation2 + $0xb0] sm:$0xff]  ;;  %v80_v33 = vld [vmem:[#allocation2 + $0xb8] sm:$0xff]  ;;  %v132_v34 = vpack.c.bf16 %v110_v22, %v109_v17  ;;  %v65_v35 = vld [vmem:[#allocation2 + $0x40] sm:$0xff]  ;;  %p752_p13 = por %p751_p12, %p750_p11 }
  0x3e   :  { %636 = vmatprep.mubr.msk.bf16.mxu0 %vm147_vm0, %v123_v20  ;;  %v66_v36 = vld [vmem:[#allocation2 + $0x48] sm:$0xff]  ;;  %v81_v37 = vld [vmem:[#allocation2 + $0xc0] sm:$0xff]  ;;  %v125_v38 = vpack.c.bf16 %v96_v28, %v95_v23  ;;  %v97_v40 = vmul.f32 %v847_v3, %v63_v26  ;;  %v98_v41 = vmul.f32 %v849_v4, %v64_v31  ;;  %v113_v43 = vmul.f32 %v847_v3, %v79_v32  ;;  %v67_v52 = vld [vmem:[#allocation2 + $0x50] sm:$0xff] }
  0x3f   :  { %652 = vmatprep.mubr.msk.bf16.mxu1 %vm147_vm0, %v131_v21  ;;  %637 = vmatmul.mubr.msk.bf16.vlgmr.msra.gmra.mrb[0].mxu0 %vm147_vm0, %v124_v27  ;;  %v133_v39 = vpack.c.bf16 %v112_v30, %v111_v29  ;;  %v82_v42 = vld [vmem:[#allocation2 + $0xc8] sm:$0xff]  ;;  %v114_v44 = vmul.f32 %v849_v4, %v80_v33  ;;  %v99_v45 = vmul.f32 %v847_v3, %v65_v35  ;;  %v68_v53 = vld [vmem:[#allocation2 + $0x58] sm:$0xff]  ;;  %v83_v54 = vld [vmem:[#allocation2 + $0xd0] sm:$0xff]  ;;  %p753_p0 = pnand %p752_p13, %p746_p10 }
  0x40   :  { %653 = vmatmul.mubr.msk.bf16.vlgmr.msra.gmra.mrb[0].mxu1 %vm147_vm0, %v132_v34  ;;  %v100_v46 = vmul.f32 %v849_v4, %v66_v36  ;;  %640 = vmatprep.mubr.msk.bf16.mxu0 %vm147_vm0, %v125_v38  ;;  %v115_v47 = vmul.f32 %v847_v3, %v81_v37  ;;  %v116_v48 = vmul.f32 %v849_v4, %v82_v42  ;;  %v84_v56 = vld [vmem:[#allocation2 + $0xd8] sm:$0xff]  ;;  %v69_v57 = vld [vmem:[#allocation2 + $0x60] sm:$0xff]  ;;  %v70_v58 = vld [vmem:[#allocation2 + $0x68] sm:$0xff] }
  0x41   :  { %656 = vmatprep.mubr.msk.bf16.mxu1 %vm147_vm0, %v133_v39  ;;  %v126_v49 = vpack.c.bf16 %v98_v41, %v97_v40  ;;  %v134_v50 = vpack.c.bf16 %v114_v44, %v113_v43  ;;  %v85_v59 = vld [vmem:[#allocation2 + $0xe0] sm:$0xff]  ;;  %v86_v60 = vld [vmem:[#allocation2 + $0xe8] sm:$0xff]  ;;  %v101_v61 = vmul.f32 %v847_v3, %v67_v52  ;;  %v102_v62 = vmul.f32 %v849_v4, %v68_v53  ;;  %v71_v10 = vld [vmem:[#allocation2 + $0x70] sm:$0xff] }
  0x42   :  { %v127_v51 = vpack.c.bf16 %v100_v46, %v99_v45  ;;  %v135_v55 = vpack.c.bf16 %v116_v48, %v115_v47  ;;  %v117_v63 = vmul.f32 %v847_v3, %v83_v54  ;;  %v118_v0 = vmul.f32 %v849_v4, %v84_v56  ;;  %v72_v11 = vld [vmem:[#allocation2 + $0x78] sm:$0xff]  ;;  %v87_v13 = vld [vmem:[#allocation2 + $0xf0] sm:$0xff] }
  0x43   :  { %v103_v1 = vmul.f32 %v847_v3, %v69_v57  ;;  %v104_v2 = vmul.f32 %v849_v4, %v70_v58  ;;  %v119_v5 = vmul.f32 %v847_v3, %v85_v59  ;;  %v120_v6 = vmul.f32 %v849_v4, %v86_v60  ;;  %v88_v14 = vld [vmem:[#allocation2 + $0xf8] sm:$0xff] }
  0x44   :  { %v128_v7 = vpack.c.bf16 %v102_v62, %v101_v61  ;;  %v136_v8 = vpack.c.bf16 %v118_v0, %v117_v63  ;;  %v105_v15 = vmul.f32 %v847_v3, %v71_v10  ;;  %v106_v16 = vmul.f32 %v849_v4, %v72_v11 }
  0x45   :  { %v129_v9 = vpack.c.bf16 %v104_v2, %v103_v1  ;;  %v137_v12 = vpack.c.bf16 %v120_v6, %v119_v5  ;;  %v121_v17 = vmul.f32 %v847_v3, %v87_v13  ;;  %v122_v18 = vmul.f32 %v849_v4, %v88_v14 }
  0x46   :  { %v130_v19 = vpack.c.bf16 %v106_v16, %v105_v15 }
  0x47   :  { %641 = vmatmul.mubr.msk.bf16.gmra.mrb[4].mxu0 %vm147_vm0, %v126_v49  ;;  %v138_v20 = vpack.c.bf16 %v122_v18, %v121_v17 }
  0x48   :  { %657 = vmatmul.mubr.msk.bf16.gmra.mrb[4].mxu1 %vm147_vm0, %v134_v50  ;;  %644 = vmatprep.mubr.msk.bf16.mxu0 %vm147_vm0, %v127_v51 }
  0x49   :  { %660 = vmatprep.mubr.msk.bf16.mxu1 %vm147_vm0, %v135_v55 }
  0x4f   :  { %645 = vmatmul.mubr.msk.bf16.gmra.mrb[8].mxu0 %vm147_vm0, %v128_v7 }
  0x50   :  { %661 = vmatmul.mubr.msk.bf16.gmra.mrb[8].mxu1 %vm147_vm0, %v136_v8  ;;  %648 = vmatprep.mubr.msk.bf16.mxu0 %vm147_vm0, %v129_v9 }
  0x51   :  { %664 = vmatprep.mubr.msk.bf16.mxu1 %vm147_vm0, %v137_v12 }
  0x57   :  { %649 = vmatmul.mubr.msk.bf16.gmra.mrb[12].mxu0 %vm147_vm0, %v130_v19 }
  0x58   :  { %665 = vmatmul.mubr.msk.bf16.gmra.mrb[12].mxu1 %vm147_vm0, %v138_v20 }
 0x112   :  { %v638_v21 = vpop.f32.mrb[0].mxu0 }
 0x113   :  { %v587_v22 = vpack.c.bf16 %v638_v21, %v638_v21  ;;  %v654_v23 = vpop.f32.mrb[0].mxu1  ;;  %v230_v24 = vpop.f32.mrb[1].mxu0 }
 0x114   :  { %v603_v25 = vpack.c.bf16 %v654_v23, %v654_v23  ;;  %v585_v26 = vpack.c.bf16 %v230_v24, %v230_v24  ;;  %v294_v27 = vpop.f32.mrb[1].mxu1  ;;  %v639_v28 = vpop.f32.mrb[2].mxu0 }
 0x115   :  { %488 = vst.msk [vmem:[#allocation8 + $0x8] sm:$0xf] %vm485_vm1, %v587_v22  ;;  %v601_v3 = vpack.c.bf16 %v294_v27, %v294_v27  ;;  %v588_v4 = vpack.c.bf16 %v639_v28, %v639_v28  ;;  %v655_v29 = vpop.f32.mrb[2].mxu1  ;;  %v233_v30 = vpop.f32.mrb[3].mxu0 }
 0x116   :  { %504 = vst.msk [vmem:[#allocation8 + $0x48] sm:$0xf] %vm485_vm1, %v603_v25  ;;  %486 = vst.msk [vmem:[#allocation8] sm:$0xf] %vm485_vm1, %v585_v26  ;;  %v604_v31 = vpack.c.bf16 %v655_v29, %v655_v29  ;;  %v586_v32 = vpack.c.bf16 %v233_v30, %v233_v30  ;;  %v297_v33 = vpop.f32.mrb[3].mxu1 }
 0x117   :  { %502 = vst.msk [vmem:[#allocation8 + $0x40] sm:$0xf] %vm485_vm1, %v601_v3  ;;  %489 = vst.msk [vmem:[#allocation8 + $0xc] sm:$0xf] %vm485_vm1, %v588_v4  ;;  %v602_v34 = vpack.c.bf16 %v297_v33, %v297_v33 }
 0x118   :  { %505 = vst.msk [vmem:[#allocation8 + $0x4c] sm:$0xf] %vm485_vm1, %v604_v31  ;;  %487 = vst.msk [vmem:[#allocation8 + $0x4] sm:$0xf] %vm485_vm1, %v586_v32 }
 0x119   :  { %503 = vst.msk [vmem:[#allocation8 + $0x44] sm:$0xf] %vm485_vm1, %v602_v34 }
 0x11a   :  { %v642_v35 = vpop.f32.mrb[4].mxu0 }
 0x11b   :  { %v591_v36 = vpack.c.bf16 %v642_v35, %v642_v35  ;;  %v658_v37 = vpop.f32.mrb[4].mxu1  ;;  %v246_v38 = vpop.f32.mrb[5].mxu0 }
 0x11c   :  { %v607_v39 = vpack.c.bf16 %v658_v37, %v658_v37  ;;  %v589_v40 = vpack.c.bf16 %v246_v38, %v246_v38  ;;  %v310_v41 = vpop.f32.mrb[5].mxu1  ;;  %v643_v42 = vpop.f32.mrb[6].mxu0 }
 0x11d   :  { %492 = vst.msk [vmem:[#allocation8 + $0x18] sm:$0xf] %vm485_vm1, %v591_v36  ;;  %v605_v43 = vpack.c.bf16 %v310_v41, %v310_v41  ;;  %v592_v44 = vpack.c.bf16 %v643_v42, %v643_v42  ;;  %v659_v45 = vpop.f32.mrb[6].mxu1  ;;  %v249_v46 = vpop.f32.mrb[7].mxu0 }
 0x11e   :  { %508 = vst.msk [vmem:[#allocation8 + $0x58] sm:$0xf] %vm485_vm1, %v607_v39  ;;  %490 = vst.msk [vmem:[#allocation8 + $0x10] sm:$0xf] %vm485_vm1, %v589_v40  ;;  %v608_v47 = vpack.c.bf16 %v659_v45, %v659_v45  ;;  %v590_v48 = vpack.c.bf16 %v249_v46, %v249_v46  ;;  %v313_v49 = vpop.f32.mrb[7].mxu1 }
 0x11f   :  { %506 = vst.msk [vmem:[#allocation8 + $0x50] sm:$0xf] %vm485_vm1, %v605_v43  ;;  %493 = vst.msk [vmem:[#allocation8 + $0x1c] sm:$0xf] %vm485_vm1, %v592_v44  ;;  %v606_v50 = vpack.c.bf16 %v313_v49, %v313_v49 }
 0x120   :  { %509 = vst.msk [vmem:[#allocation8 + $0x5c] sm:$0xf] %vm485_vm1, %v608_v47  ;;  %491 = vst.msk [vmem:[#allocation8 + $0x14] sm:$0xf] %vm485_vm1, %v590_v48 }
 0x121   :  { %507 = vst.msk [vmem:[#allocation8 + $0x54] sm:$0xf] %vm485_vm1, %v606_v50 }
 0x122   :  { %v646_v51 = vpop.f32.mrb[8].mxu0 }
 0x123   :  { %v595_v52 = vpack.c.bf16 %v646_v51, %v646_v51  ;;  %v662_v53 = vpop.f32.mrb[8].mxu1  ;;  %v262_v54 = vpop.f32.mrb[9].mxu0 }
 0x124   :  { %v611_v55 = vpack.c.bf16 %v662_v53, %v662_v53  ;;  %v593_v56 = vpack.c.bf16 %v262_v54, %v262_v54  ;;  %v326_v57 = vpop.f32.mrb[9].mxu1  ;;  %v647_v58 = vpop.f32.mrb[10].mxu0 }
 0x125   :  { %496 = vst.msk [vmem:[#allocation8 + $0x28] sm:$0xf] %vm485_vm1, %v595_v52  ;;  %v609_v59 = vpack.c.bf16 %v326_v57, %v326_v57  ;;  %v596_v60 = vpack.c.bf16 %v647_v58, %v647_v58  ;;  %v663_v61 = vpop.f32.mrb[10].mxu1  ;;  %v265_v62 = vpop.f32.mrb[11].mxu0 }
 0x126   :  { %512 = vst.msk [vmem:[#allocation8 + $0x68] sm:$0xf] %vm485_vm1, %v611_v55  ;;  %494 = vst.msk [vmem:[#allocation8 + $0x20] sm:$0xf] %vm485_vm1, %v593_v56  ;;  %v612_v63 = vpack.c.bf16 %v663_v61, %v663_v61  ;;  %v594_v0 = vpack.c.bf16 %v265_v62, %v265_v62  ;;  %v329_v1 = vpop.f32.mrb[11].mxu1 }
 0x127   :  { %510 = vst.msk [vmem:[#allocation8 + $0x60] sm:$0xf] %vm485_vm1, %v609_v59  ;;  %497 = vst.msk [vmem:[#allocation8 + $0x2c] sm:$0xf] %vm485_vm1, %v596_v60  ;;  %v610_v2 = vpack.c.bf16 %v329_v1, %v329_v1 }
 0x128   :  { %513 = vst.msk [vmem:[#allocation8 + $0x6c] sm:$0xf] %vm485_vm1, %v612_v63  ;;  %495 = vst.msk [vmem:[#allocation8 + $0x24] sm:$0xf] %vm485_vm1, %v594_v0 }
 0x129   :  { %511 = vst.msk [vmem:[#allocation8 + $0x64] sm:$0xf] %vm485_vm1, %v610_v2 }
 0x12a   :  { %v650_v5 = vpop.f32.mrb[12].mxu0 }
 0x12b   :  { %v599_v6 = vpack.c.bf16 %v650_v5, %v650_v5  ;;  %v666_v7 = vpop.f32.mrb[12].mxu1  ;;  %v278_v8 = vpop.f32.mrb[13].mxu0 }
 0x12c   :  { %v615_v9 = vpack.c.bf16 %v666_v7, %v666_v7  ;;  %v597_v10 = vpack.c.bf16 %v278_v8, %v278_v8  ;;  %v342_v11 = vpop.f32.mrb[13].mxu1  ;;  %v651_v12 = vpop.f32.mrb[14].mxu0 }
 0x12d   :  { %500 = vst.msk [vmem:[#allocation8 + $0x38] sm:$0xf] %vm485_vm1, %v599_v6  ;;  %v613_v13 = vpack.c.bf16 %v342_v11, %v342_v11  ;;  %v600_v14 = vpack.c.bf16 %v651_v12, %v651_v12  ;;  %v667_v15 = vpop.f32.mrb[14].mxu1  ;;  %v281_v16 = vpop.f32.mrb[15].mxu0 }
 0x12e   :  { %516 = vst.msk [vmem:[#allocation8 + $0x78] sm:$0xf] %vm485_vm1, %v615_v9  ;;  %498 = vst.msk [vmem:[#allocation8 + $0x30] sm:$0xf] %vm485_vm1, %v597_v10  ;;  %v616_v17 = vpack.c.bf16 %v667_v15, %v667_v15  ;;  %v598_v18 = vpack.c.bf16 %v281_v16, %v281_v16  ;;  %v345_v19 = vpop.f32.mrb[15].mxu1 }
 0x12f   :  { %514 = vst.msk [vmem:[#allocation8 + $0x70] sm:$0xf] %vm485_vm1, %v613_v13  ;;  %501 = vst.msk [vmem:[#allocation8 + $0x3c] sm:$0xf] %vm485_vm1, %v600_v14  ;;  %v614_v20 = vpack.c.bf16 %v345_v19, %v345_v19 }
 0x130   :  { %517 = vst.msk [vmem:[#allocation8 + $0x7c] sm:$0xf] %vm485_vm1, %v616_v17  ;;  %499 = vst.msk [vmem:[#allocation8 + $0x34] sm:$0xf] %vm485_vm1, %v598_v18 }
 0x131   :  { %515 = vst.msk [vmem:[#allocation8 + $0x74] sm:$0xf] %vm485_vm1, %v614_v20 }
 0x132   :  { %756 = shalt.err (!%p753_p0)
}
 0x133   :  { %s757_s27 = scalar_lea.hbm %s949_s3, 2048 }
 0x134   :  { %p758_p1 = scmp.ne.s32.totalorder %s949_s3, %s757_s27  ;;  %p761_p2 = scmp.lt.u32.totalorder %s757_s27, %s949_s3 }
 0x136   :  { %p763_p3 = pnand %p761_p2, %p758_p1 }
 0x138   :  { %766 = shalt.err (!%p763_p3)
}
 0x139   :  { %529 = dma.vmem_to_hbm [thread:$0]  %s524_s23, 2048, %s949_s3, [#allocation4], %s778_s0, %s778_s0, %s779_s15  }
 0x13a   :  { %771 = dma.done.wait [#allocation4], 2048  }
 0x13b   :  { %772 = vsyncadd [#allocation4], 4294965248 }
 0x13c   :  { %533 = vsyncpa [#allocation3], 1 }
 0x13d   :  { %534 = vsyncpa [#allocation6], 1 }
 0x13e   :  { %535 = vsyncpa [#allocation4], 1 }

</bundles_post_ra>
